<compile_context>
chip_gen: v6e
topology: v6e:2x2x1
jax: 0.10.0
libtpu: 0.0.40
codegen_flags: <defaults>
</compile_context>

<pallas_src>
import jax
import jax.numpy as jnp
from jax import lax
from jax.experimental import pallas as pl
from jax.experimental.pallas import tpu as pltpu


def _label_embedder_kernel(eff_ref, table_ref, out_ref):
    """Vectorized embedding gather for one batch tile.

    eff_ref   : VMEM int32 (tb, 1)  -- effective (post-drop) labels
    table_ref : VMEM (V, Hp)        -- embedding table, resident across grid
    out_ref   : VMEM (tb, Hp)       -- gathered embeddings for this tile
    """
    tb = out_ref.shape[0]
    V = table_ref.shape[0]
    # One-hot gather on the MXU: exactly one 1.0 per row -> exact lookup,
    # dense (8,128)-aligned stores, no masked per-row vst.msk sequences.
    onehot = eff_ref[...] == lax.broadcasted_iota(jnp.int32, (tb, V), 1)
    out_ref[...] = jnp.dot(
        onehot.astype(table_ref.dtype), table_ref[...],
        preferred_element_type=jnp.float32,
    ).astype(out_ref.dtype)


def _make_drop_ids(batch, dropout_prob, train, force_drop_ids, rng):
    """Mirror of LabelEmbedder.token_drop's drop-mask computation."""
    use_dropout = dropout_prob > 0
    if (train and use_dropout) or (force_drop_ids is not None):
        if force_drop_ids is None:
            # TODO(synk): torch.rand uses global RNG state; here we use an
            # explicit jax.random key with identical Bernoulli(p) semantics.
            if rng is None:
                rng = jax.random.PRNGKey(0)
            drop = jax.random.uniform(rng, (batch,)) < dropout_prob
        else:
            drop = force_drop_ids == 1
    else:
        drop = jnp.zeros((batch,), dtype=bool)
    return drop.astype(jnp.int32)


def label_embedder_forward(labels, embedding_table, num_classes, dropout_prob,
                           train=True, force_drop_ids=None, rng=None):
    """labels: (B,) int -> (B, hidden_size) embeddings."""
    labels = labels.astype(jnp.int32)
    B = labels.shape[0]
    V, H = embedding_table.shape  # V = num_classes + use_cfg_embedding

    # Classifier-free-guidance token drop fused into the indices (wrapper-side
    # select: one VPU op total instead of one per row inside the kernel).
    drop_ids = _make_drop_ids(B, dropout_prob, train, force_drop_ids, rng)
    eff = jnp.where(drop_ids != 0, num_classes, labels).astype(jnp.int32)

    # Batch tile: multiple of 8 sublanes, up to 512 rows per grid step so the
    # ~0.35 us/step overhead is amortized.  512 keeps (table x2 + out tile x2
    # + one-hot temp) inside every generation's scoped-VMEM budget at DiT
    # scale (v5e 16 MiB default is the tightest; raised below if needed).
    tb = min(512, 8 * pl.cdiv(B, 8))
    Bp = pl.cdiv(B, tb) * tb
    if Bp != B:
        eff = jnp.pad(eff, (0, Bp - B))      # padded rows gather table[0]; discarded
    eff2d = eff.reshape(Bp, 1)               # (tb, 1) blocks: sublane-only index load

    # Lane-dense output: pad hidden dim to a multiple of 128 (only matters for
    # small-H configs; DiT H=1152 is already 9*128).
    Hp = 128 * pl.cdiv(H, 128)
    table = embedding_table
    if Hp != H:
        table = jnp.pad(table, ((0, 0), (0, Hp - H)))

    n_tiles = Bp // tb
    itemsize = jnp.dtype(embedding_table.dtype).itemsize
    # table double-buffered + output tile double-buffered + one-hot temp.
    vmem_est = (2 * V * Hp + 2 * tb * Hp) * itemsize + tb * V * 4 + (1 << 20)

    compiler_kwargs = dict(
        dimension_semantics=("parallel",) if n_tiles > 1 else ("arbitrary",),
    )
    if vmem_est > 14 * 1024 * 1024:
        # Raise the scoped-VMEM limit only when the defaults (v5e 16 MiB /
        # v6e 32 MiB / v7x 32 MiB) could be too tight; cap well under v7x's
        # 64 MiB physical VMEM.
        compiler_kwargs["vmem_limit_bytes"] = min(vmem_est + (8 << 20),
                                                  56 * 1024 * 1024)

    out = pl.pallas_call(
        _label_embedder_kernel,
        out_shape=jax.ShapeDtypeStruct((Bp, Hp), embedding_table.dtype),
        grid=(n_tiles,),
        in_specs=[
            # effective labels, one (tb, 1) int32 block per grid step
            pl.BlockSpec((tb, 1), lambda i: (i, 0)),
            # whole embedding table, VMEM-resident (constant block index ->
            # fetched once, never re-streamed per batch tile)
            pl.BlockSpec((V, Hp), lambda i: (0, 0)),
        ],
        out_specs=pl.BlockSpec((tb, Hp), lambda i: (i, 0)),
        compiler_params=pltpu.CompilerParams(**compiler_kwargs),
    )(eff2d, table)

    return out[:B, :H]


if __name__ == "__main__":
    num_classes, hidden_size, dropout_prob, batch = 10, 32, 0.1, 8
    use_cfg = 1  # dropout_prob > 0 -> extra "null" embedding row

    key = jax.random.PRNGKey(0)
    k_tbl, k_lbl, k_drop = jax.random.split(key, 3)

    # nn.Embedding default init: N(0, 1).  bf16 tables are also supported by
    # the kernel (halves DMA + VMEM) if the surrounding model permits.
    table = jax.random.normal(k_tbl, (num_classes + use_cfg, hidden_size),
                              jnp.float32)
    labels = jax.random.randint(k_lbl, (batch,), 0, num_classes,
                                dtype=jnp.int32)

    def ref_forward(lbls, train, force_drop_ids, rng):
        drop = _make_drop_ids(batch, dropout_prob, train, force_drop_ids, rng)
        eff = jnp.where(drop != 0, num_classes, lbls)
        return table[eff]

    # 1) eval mode: plain embedding lookup
    out_eval = jax.block_until_ready(
        label_embedder_forward(labels, table, num_classes, dropout_prob,
                               train=False))
    assert out_eval.shape == (batch, hidden_size), out_eval.shape
    assert jnp.allclose(out_eval, ref_forward(labels, False, None, None))

    # 2) deterministic CFG drop via force_drop_ids
    force = jnp.array([1, 0, 0, 1, 0, 0, 0, 1], dtype=jnp.int32)
    out_force = jax.block_until_ready(
        label_embedder_forward(labels, table, num_classes, dropout_prob,
                               train=True, force_drop_ids=force))
    assert jnp.allclose(out_force, ref_forward(labels, True, force, None))

    # 3) train-mode random drop (same rng used by kernel wrapper and reference)
    out_train = jax.block_until_ready(
        label_embedder_forward(labels, table, num_classes, dropout_prob,
                               train=True, rng=k_drop))
    assert jnp.allclose(out_train, ref_forward(labels, True, None, k_drop))

    print("KERNEL_OK")
</pallas_src>

<mosaic_0001>
module attributes {stable_mosaic.version = 11 : i64} {
  func.func @_label_embedder_kernel(%arg0: i32, %arg1: memref<8x1xi32, #tpu.memory_space<vmem>>, %arg2: memref<11x128xf32, #tpu.memory_space<vmem>>, %arg3: memref<8x128xf32, #tpu.memory_space<vmem>>) attributes {dimension_semantics = [#tpu.dimension_semantics<arbitrary>], iteration_bounds = array<i64: 1>, scalar_prefetch = 0 : i64, scratch_operands = 0 : i64, tpu.core_type = #tpu.core_type<tc>, window_params = [{transform_indices = @transform_0, window_bounds = array<i64: 8, 1>}, {pipeline_mode = #tpu.pipeline_mode<synchronous>, transform_indices = @transform_1, window_bounds = array<i64: 11, 128>}, {transform_indices = @transform_2, window_bounds = array<i64: 8, 128>}]} {
    %c0 = arith.constant 0 : index
    %c0_0 = arith.constant 0 : index
    %0 = vector.load %arg1[%c0, %c0_0] : memref<8x1xi32, #tpu.memory_space<vmem>>, vector<8x1xi32>
    %1 = tpu.iota {dimensions = array<i32: 1>} : vector<8x11xi32>
    %2 = vector.broadcast %0 : vector<8x1xi32> to vector<8x11xi32>
    %3 = arith.cmpi eq, %2, %1 : vector<8x11xi32>
    %4 = arith.extui %3 : vector<8x11xi1> to vector<8x11xi32>
    %5 = arith.sitofp %4 : vector<8x11xi32> to vector<8x11xf32>
    %c0_1 = arith.constant 0 : index
    %c0_2 = arith.constant 0 : index
    %6 = vector.load %arg2[%c0_1, %c0_2] : memref<11x128xf32, #tpu.memory_space<vmem>>, vector<11x128xf32>
    %cst = arith.constant dense<0.000000e+00> : vector<8x128xf32>
    %7 = tpu.matmul %5, %6, %cst {dimension_numbers = #tpu.dot_dimension_numbers<[1], [0], [0], [1], [0, 0, 1, 1], [], []>} : vector<8x11xf32>, vector<11x128xf32>, vector<8x128xf32> -> vector<8x128xf32>
    %c0_3 = arith.constant 0 : index
    %c0_4 = arith.constant 0 : index
    %8 = vector.load %arg3[%c0_3, %c0_4] : memref<8x128xf32, #tpu.memory_space<vmem>>, vector<8x128xf32>
    tpu.vector_store %arg3[%c0_3, %c0_4], %7 {strides = array<i32>} : memref<8x128xf32, #tpu.memory_space<vmem>>, vector<8x128xf32>,
    return
  }
  func.func @transform_0(%arg0: i32) -> (i32, i32) {
    %c0_i32 = arith.constant 0 : i32
    %c0_i32_0 = arith.constant 0 : i32
    return %arg0, %c0_i32 : i32, i32
  }
  func.func @transform_1(%arg0: i32) -> (i32, i32) {
    %c0_i32 = arith.constant 0 : i32
    %c0_i32_0 = arith.constant 0 : i32
    %c0_i32_1 = arith.constant 0 : i32
    return %c0_i32, %c0_i32_0 : i32, i32
  }
  func.func @transform_2(%arg0: i32) -> (i32, i32) {
    %c0_i32 = arith.constant 0 : i32
    %c0_i32_0 = arith.constant 0 : i32
    return %arg0, %c0_i32 : i32, i32
  }
}

</mosaic_0001>

<bundles_post_ra>
// kernel: tpu_custom_call.1
= control target key start
LH: loop header
LB: loop body
LE: loop exit
PB: predicated region body
PF: predicated region fallthrough
CT: control target
= control target key end

     0   :  { %7 = vsyncpa [#allocation3], 0  ;;  %s227_s0 = inlined_call_operand.vmem [shape: s32[8,1], index: 0, kind: input, shape index: {}]   ;;  %s228_s1 = inlined_call_operand.hbm [shape: f32[11,128], index: 1, kind: input, shape index: {}]   ;;  %s229_s2 = inlined_call_operand.hbm [shape: f32[8,128], index: 2, kind: output, shape index: {}]  }
   0x1   :  { %8 = vsyncpa [#allocation4], 0  ;;  %s196_s9 = smov [#allocation2]  }
   0x2   :  { %s16_s10 = sshll.u32 %s196_s9, 4  ;;  %s17_s10 = int_to_ptr.vmem [resolvable:$true] %s16_s10 }
   0x3   :  { %s160_s11 = scalar_lea.vmem %s17_s10, 256  ;;  %p165_p1 = scmp.lt.s32.totalorder %s17_s10, %s17_s10 }
   0x4   :  { %p161_p0 = scmp.ne.s32.totalorder %s17_s10, %s160_s11  ;;  %p166_p2 = scmp.lt.s32.totalorder %s160_s11, %s160_s11 }
   0x6   :  { %p167_p3 = por %p166_p2, %p165_p1 }
   0x8   :  { %p168_p4 = pnand %p167_p3, %p161_p0 }
   0xa   :  { %171 = shalt.err (!%p168_p4)
}
   0xb   :  { %s197_s12 = smov 128   ;;  %s198_s13 = smov 8  }
   0xc   :  { %22 = dma.hbm_to_vmem [thread:$0]  %s228_s1, 256, %s17_s10, [#allocation3], %s197_s12, %s197_s12, %s198_s13  }
   0xd   :  { %192 = dma.done.wait [#allocation3], 256  }
   0xe   :  { %193 = vsyncadd [#allocation3], 4294967040  ;;  %v199_v0 = vmov 0   ;;  %v200_v1 = vmov 0.0   ;;  %vm41_vm0 = vcmask 1042432   ;;  %vm201_vm1 = vmmov 0  }
   0xf   :  { %151 = vset.pattern.permute.xlu0 %v199_v0  ;;  %137 = vmatprep.subr.mxu0 %v200_v1  ;;  %v26_v2 = vld [vmem:[%s227_s0] sm:$0xff]  ;;  %v36_v3 = vld [vmem:[#allocation2 + $0x8] sm:$0x7]  ;;  %v27_v5 = vlaneseq  ;;  %vm37_vm2 = vcmask 89088   ;;  %s202_s1 = smov [#allocation5]  }
  0x10   :  { %141 = vmatprep.mubr.msk.f32.mxu0 %vm201_vm1, %v200_v1  ;;  %v35_v4 = vld [vmem:[#allocation2] sm:$0xff]  ;;  %30 = vperm.xlu0 %151, %v26_v2   ;;  %s122_s18 = sshll.u32 %s202_s1, 4  ;;  %s123_s18 = int_to_ptr.vmem [resolvable:$true] %s122_s18 }
  0x11   :  { %138 = vmatpush3.msk.msra.mxu0 %vm41_vm0, %v36_v3  ;;  %v28_v6 = vand.u32 127, %v27_v5  ;;  %s172_s0 = scalar_lea.vmem %s123_s18, 128  ;;  %p177_p6 = scmp.lt.s32.totalorder %s123_s18, %s123_s18 }
  0x12   :  { %139 = vmatprep.subr.mxu0 %v200_v1  ;;  %p173_p5 = scmp.ne.s32.totalorder %s123_s18, %s172_s0  ;;  %p178_p7 = scmp.lt.s32.totalorder %s172_s0, %s172_s0 }
  0x13   :  { %140 = vmatpush3.msra.mxu0 %v35_v4 }
  0x14   :  { %p179_p8 = por %p178_p7, %p177_p6 }
  0x16   :  { %p180_p9 = pnand %p179_p8, %p173_p5 }
  0x8b   :  { %v31_v7 = vpop.permute.xlu0 %30 }
  0x8c   :  { %vm32_vm3 = vcmp.eq.s32.totalorder %v31_v7, %v28_v6 }
  0x8d   :  { %v131_v8 = vsel %vm32_vm3, 1.0, %v200_v1 }
  0x8e   :  { %142 = vmatmul.mubr.msk.f32.vlgmr.msra.gmra.mxu0 %vm37_vm2, %v131_v8 }
 0x14e   :  { %v111_v9 = vpop.f32.mrf.mxu0 }
 0x14f   :  { %115 = vst [vmem:[#allocation5] sm:$0xff] %v111_v9 }
 0x150   :  { %v143_v10 = vpop.f32.mrf.mxu0 }
 0x151   :  { %183 = shalt.err (!%p180_p9)
}
 0x152   :  { %125 = dma.vmem_to_hbm [thread:$0]  %s123_s18, 128, %s229_s2, [#allocation4]  }
 0x153   :  { %194 = dma.done.wait [#allocation4], 128  }
 0x154   :  { %195 = vsyncadd [#allocation4], 4294967168 }
 0x155   :  { %129 = vsyncpa [#allocation3], 1 }
 0x156   :  { %130 = vsyncpa [#allocation4], 1 }

</bundles_post_ra>
